<compile_context>
chip_gen: v6e
topology: v6e:2x2x1
jax: 0.10.0
libtpu: 0.0.40
codegen_flags: <defaults>
</compile_context>

<pallas_src>
import functools

import jax
import jax.numpy as jnp
import numpy as np
from jax.experimental import pallas as pl
from jax.experimental.pallas import tpu as pltpu


# ---------------------------------------------------------------------------
# Pallas kernel
# ---------------------------------------------------------------------------
def _make_interactor_kernel(LW, L, K1, K2, pad_l):
    """LW: lane width (multiple of 128, >= L + pad_l + pad_r).  All activations
    are 2-D (rows, LW); rows = batch_tile * 2C (or * 2H for hidden)."""

    def conv_pair(src, w1_ref, b1_ref, w2_ref, b2_ref):
        # src is laid out replication-padded: [left halo | data | right edge].
        # Per-tap accumulation with lane rolls; each tap is a single 2-D matmul
        # whose batch-block-diagonal weight covers the whole batch tile.
        h = jnp.dot(w1_ref[0], src, preferred_element_type=jnp.float32)
        for k in range(1, K1):
            shifted = pltpu.roll(src, shift=LW - k, axis=1)      # [:, j] <- src[:, j+k]
            h = h + jnp.dot(w1_ref[k], shifted, preferred_element_type=jnp.float32)
        h = h + b1_ref[...]
        h = jnp.where(h > 0, h, 0.01 * h)       # LeakyReLU(0.01); Dropout = identity (eval)
        o = jnp.dot(w2_ref[0], h, preferred_element_type=jnp.float32)
        for k in range(1, K2):
            shifted = pltpu.roll(h, shift=LW - k, axis=1)
            o = o + jnp.dot(w2_ref[k], shifted, preferred_element_type=jnp.float32)
        return jnp.tanh(o + b2_ref[...])

    def kernel(xp_ref, wa1_ref, ba1_ref, wa2_ref, ba2_ref,
               wb1_ref, bb1_ref, wb2_ref, bb2_ref, out_ref):
        xp = xp_ref[...]                                   # (Bt*2C, LW)

        # stage A: t = [psi(x_odd); phi(x_even)] per batch (routing is folded
        # into the weights) so the elementwise step needs no sublane shuffle.
        t = conv_pair(xp, wa1_ref, ba1_ref, wa2_ref, ba2_ref)

        # recover the un-padded signal aligned at lane 0 and form dc = [c; d]
        xc = pltpu.roll(xp, shift=LW - pad_l, axis=1)
        dc = xc * jnp.exp(t)

        # rebuild the replication-padded layout for stage B (columns >= L and
        # the pad_l-wide left halo are the only ones needing a fix-up).
        lane = jax.lax.broadcasted_iota(jnp.int32, (1, LW), 1)
        right = jnp.broadcast_to(dc[:, L - 1:L], dc.shape)
        left = jnp.broadcast_to(dc[:, 0:1], dc.shape)
        dcf = jnp.where(lane >= L, right, dc)
        dcp = pltpu.roll(dcf, shift=pad_l, axis=1)
        dcp = jnp.where(lane < pad_l, left, dcp)

        # stage B: t2 = [U(d); -P(c)]  (the minus is folded into P's second
        # conv weights/bias through the odd tanh).
        t2 = conv_pair(dcp, wb1_ref, bb1_ref, wb2_ref, bb2_ref)

        out_ref[...] = dc + t2                              # [even_update; odd_update]

    return kernel


# ---------------------------------------------------------------------------
# Wrapper helpers
# ---------------------------------------------------------------------------
def _block_diag_over_batch(blk, Bt):
    # blk: (K, O, I) per-batch weight block -> (K, Bt*O, Bt*I) block-diagonal.
    K, O, I = blk.shape
    eye = jnp.eye(Bt, dtype=blk.dtype)
    big = jnp.einsum("bc,koi->kboci", eye, blk)
    return big.reshape(K, Bt * O, Bt * I)


def _pick_batch_tile(B, C, H, batch_tile):
    divisors = [d for d in range(1, B + 1) if B % d == 0]
    # hard constraint: block rows must be a multiple of 8 (sublane tiling)
    # unless the block covers the whole batch dimension.
    ok = [d for d in divisors if (d * 2 * C) % 8 == 0 or d == B]
    if not ok:
        return B

    def score(d):
        return (
            d <= max(1, batch_tile),          # respect requested tile size
            d * 2 * max(C, H) <= 256,         # keep block-diag weights small
            (B // d) >= 2 or B == 1,          # >=2 grid steps (v7x: 2 TensorCores)
            d,                                # then as large as possible
        )

    return max(ok, key=score)


# ---------------------------------------------------------------------------
# Wrapper
# ---------------------------------------------------------------------------
def interactor_pallas(x, params, *, kernel_size=5, batch_tile=8):
    """x: (B, T, C) float32.  Returns (even_update, odd_update) in (B, C, L)
    layout exactly like the PyTorch module (channels-first after its permute)."""
    B, T, C = x.shape
    W1, B1, W2, B2 = params            # (4,K1,H,C), (4,H,1), (4,K2,C,H), (4,C,1)
    _, K1, H, _ = W1.shape
    K2 = W2.shape[1]
    assert K1 == kernel_size

    if kernel_size % 2 == 0:
        pad_l = (kernel_size - 2) // 2 + 1
        pad_r = kernel_size // 2 + 1
    else:
        pad_l = pad_r = (kernel_size - 1) // 2 + 1

    # --- Splitting (glue, plain JAX) ----------------------------------------
    even = x[:, ::2, :]
    odd = x[:, 1::2, :]
    e_len, o_len = even.shape[1], odd.shape[1]
    L = max(e_len, o_len)
    if o_len < L:
        odd = jnp.pad(odd, ((0, 0), (0, L - o_len), (0, 0)), mode="edge")
    elif e_len < L:
        even = jnp.pad(even, ((0, 0), (0, L - e_len), (0, 0)), mode="edge")

    xe = jnp.transpose(even, (0, 2, 1)).astype(jnp.float32)      # (B, C, L)
    xo = jnp.transpose(odd, (0, 2, 1)).astype(jnp.float32)
    xeo = jnp.concatenate([xe, xo], axis=1)                      # (B, 2C, L)

    # Single lane-dense activation buffer (the ONLY streamed input):
    # [pad_l left halo | data | right edge replicated to fill], width LW.
    LW = ((L + pad_l + pad_r + 127) // 128) * 128
    xp = jnp.pad(xeo, ((0, 0), (0, 0), (pad_l, LW - L - pad_l)), mode="edge")
    xp2d = xp.reshape(B * 2 * C, LW)

    # --- batch tile (divides B, no padding / wasted work) --------------------
    Bt = _pick_batch_tile(B, C, H, batch_tile)
    Mrows, MH = Bt * 2 * C, Bt * 2 * H

    # --- weights: branch routing + P-sign + batch block-diagonal fusion ------
    f32 = jnp.float32

    def conv1_block(w_in1, w_in0):
        # hidden[:H] <- input half 1, hidden[H:] <- input half 0
        blk = jnp.zeros((K1, 2 * H, 2 * C), f32)
        blk = blk.at[:, :H, C:].set(w_in1.astype(f32))
        blk = blk.at[:, H:, :C].set(w_in0.astype(f32))
        return blk

    def conv2_block(w_top, w_bot):
        blk = jnp.zeros((K2, 2 * C, 2 * H), f32)
        blk = blk.at[:, :C, :H].set(w_top.astype(f32))
        blk = blk.at[:, C:, H:].set(w_bot.astype(f32))
        return blk

    # stage A produces t = [psi(x_odd); phi(x_even)]  =>  dc = xc*exp(t) = [c; d]
    blkA1 = conv1_block(W1[1], W1[0])
    blkA2 = conv2_block(W2[1], W2[0])
    bA1 = jnp.concatenate([B1[1], B1[0]], axis=0).astype(f32)    # (2H,1)
    bA2 = jnp.concatenate([B2[1], B2[0]], axis=0).astype(f32)    # (2C,1)
    # stage B produces t2 = [U(d); -P(c)]  (sign folded through the odd tanh)
    blkB1 = conv1_block(W1[2], W1[3])
    blkB2 = conv2_block(W2[2], -W2[3])
    bB1 = jnp.concatenate([B1[2], B1[3]], axis=0).astype(f32)
    bB2 = jnp.concatenate([B2[2], -B2[3]], axis=0).astype(f32)

    WA1 = _block_diag_over_batch(blkA1, Bt)
    WA2 = _block_diag_over_batch(blkA2, Bt)
    WB1 = _block_diag_over_batch(blkB1, Bt)
    WB2 = _block_diag_over_batch(blkB2, Bt)
    BA1 = jnp.tile(bA1, (Bt, 1))
    BA2 = jnp.tile(bA2, (Bt, 1))
    BB1 = jnp.tile(bB1, (Bt, 1))
    BB2 = jnp.tile(bB2, (Bt, 1))

    kernel = _make_interactor_kernel(LW, L, K1, K2, pad_l)

    # VMEM budget: double-buffered activation blocks + resident fused weights +
    # a handful of full-width temporaries; clamped to v7x's 64 MiB.
    block_bytes = Mrows * LW * 4
    weight_bytes = 4 * (2 * K1 * MH * Mrows + 2 * K2 * Mrows * MH + 2 * MH + 2 * Mrows)
    interm_bytes = 6 * max(Mrows, MH) * LW * 4
    vmem_limit = int(min(max(4 * block_bytes + weight_bytes + interm_bytes + (4 << 20),
                             16 << 20), 64 << 20))

    def const_spec(a):
        return pl.BlockSpec(a.shape, lambda g, _n=a.ndim: (0,) * _n)

    out = pl.pallas_call(
        kernel,
        out_shape=jax.ShapeDtypeStruct((B * 2 * C, LW), jnp.float32),
        grid_spec=pltpu.PrefetchScalarGridSpec(
            num_scalar_prefetch=0,
            grid=(B // Bt,),
            in_specs=[
                pl.BlockSpec((Mrows, LW), lambda g: (g, 0)),
                const_spec(WA1), const_spec(BA1), const_spec(WA2), const_spec(BA2),
                const_spec(WB1), const_spec(BB1), const_spec(WB2), const_spec(BB2),
            ],
            out_specs=pl.BlockSpec((Mrows, LW), lambda g: (g, 0)),
        ),
        compiler_params=pltpu.CompilerParams(
            dimension_semantics=("parallel",),
            vmem_limit_bytes=vmem_limit),
    )(xp2d, WA1, BA1, WA2, BA2, WB1, BB1, WB2, BB2)

    out = out.reshape(B, 2 * C, LW)
    even_update = out[:, :C, :e_len]
    odd_update = out[:, C:, :o_len]
    return even_update, odd_update


# ---------------------------------------------------------------------------
# Pure-JAX reference (same math, no Pallas) for a correctness check
# ---------------------------------------------------------------------------
def _branch_ref(x, w1, b1, w2, b2, pad_l, pad_r):
    K1, H, C = w1.shape
    K2 = w2.shape[0]
    L = x.shape[-1]
    xp = jnp.pad(x, ((0, 0), (0, 0), (pad_l, pad_r)), mode="edge")
    L1 = L + pad_l + pad_r - (K1 - 1)
    h = jnp.zeros((x.shape[0], H, L1), jnp.float32)
    for k in range(K1):
        h = h + jnp.einsum("hc,bcl->bhl", w1[k], xp[:, :, k:k + L1],
                           precision=jax.lax.Precision.HIGHEST)
    h = h + b1[None]
    h = jnp.where(h > 0, h, 0.01 * h)
    L2 = L1 - (K2 - 1)
    o = jnp.zeros((x.shape[0], C, L2), jnp.float32)
    for k in range(K2):
        o = o + jnp.einsum("ch,bhl->bcl", w2[k], h[:, :, k:k + L2],
                           precision=jax.lax.Precision.HIGHEST)
    o = o + b2[None]
    return jnp.tanh(o)


def interactor_ref(x, params, *, kernel_size=5):
    W1, B1, W2, B2 = params
    pad_l = pad_r = (kernel_size - 1) // 2 + 1   # odd kernel sizes only
    even = x[:, ::2, :]
    odd = x[:, 1::2, :]
    flag = 0
    if odd.shape[1] < even.shape[1]:
        odd = jnp.pad(odd, ((0, 0), (0, even.shape[1] - odd.shape[1]), (0, 0)),
                      mode="edge")
        flag = 1
    elif even.shape[1] < odd.shape[1]:
        even = jnp.pad(even, ((0, 0), (0, odd.shape[1] - even.shape[1]), (0, 0)),
                       mode="edge")
        flag = 2
    xe = jnp.transpose(even, (0, 2, 1)).astype(jnp.float32)
    xo = jnp.transpose(odd, (0, 2, 1)).astype(jnp.float32)
    br = lambda z, i: _branch_ref(z, W1[i], B1[i], W2[i], B2[i], pad_l, pad_r)
    d = xo * jnp.exp(br(xe, 0))
    c = xe * jnp.exp(br(xo, 1))
    eu = c + br(d, 2)
    ou = d - br(c, 3)
    if flag == 1:
        ou = ou[:, :, :-1]
    elif flag == 2:
        eu = eu[:, :, :-1]
    return eu, ou


# ---------------------------------------------------------------------------
# Deterministic parameter init (PyTorch Conv1d default: U(-1/sqrt(fan), +))
# ---------------------------------------------------------------------------
def init_params(key, C, hidden_size=1, kernel_size=5):
    H = int(C * hidden_size)
    K1, K2 = kernel_size, 3
    k1, k2, k3, k4 = jax.random.split(key, 4)
    bound1 = 1.0 / np.sqrt(C * K1)
    bound2 = 1.0 / np.sqrt(H * K2)
    # 4 branches stacked: 0=phi, 1=psi, 2=U, 3=P
    W1 = jax.random.uniform(k1, (4, K1, H, C), jnp.float32, -bound1, bound1)
    B1 = jax.random.uniform(k2, (4, H, 1), jnp.float32, -bound1, bound1)
    W2 = jax.random.uniform(k3, (4, K2, C, H), jnp.float32, -bound2, bound2)
    B2 = jax.random.uniform(k4, (4, C, 1), jnp.float32, -bound2, bound2)
    return W1, B1, W2, B2


if __name__ == "__main__":
    key = jax.random.PRNGKey(0)
    kx, kx2, kx3, kp = jax.random.split(key, 4)

    C, hidden_size, kernel_size = 4, 1, 5
    params = init_params(kp, C, hidden_size, kernel_size)

    # DEFAULT-precision MXU vs HIGHEST-precision reference: ~1e-3 differences,
    # so use a 1e-2 tolerance.
    TOL = 1e-2

    # --- test 1: odd T (exercises the flag==1 replicate/trim path) -----------
    B, T = 2, 17
    x = jax.random.normal(kx, (B, T, C), jnp.float32)
    run = functools.partial(interactor_pallas, kernel_size=kernel_size)
    even_upd, odd_upd = jax.jit(run)(x, params)
    jax.block_until_ready((even_upd, odd_upd))
    ref_even, ref_odd = interactor_ref(x, params, kernel_size=kernel_size)
    np.testing.assert_allclose(np.asarray(even_upd), np.asarray(ref_even),
                               rtol=TOL, atol=TOL)
    np.testing.assert_allclose(np.asarray(odd_upd), np.asarray(ref_odd),
                               rtol=TOL, atol=TOL)
    assert even_upd.shape == (B, C, (T + 1) // 2)
    assert odd_upd.shape == (B, C, T // 2)

    # --- test 2: even T, small requested batch tile --------------------------
    B2_, T2 = 3, 16
    x2 = jax.random.normal(kx2, (B2_, T2, C), jnp.float32)
    run2 = functools.partial(interactor_pallas, kernel_size=kernel_size,
                             batch_tile=2)
    eu2, ou2 = jax.jit(run2)(x2, params)
    jax.block_until_ready((eu2, ou2))
    re2, ro2 = interactor_ref(x2, params, kernel_size=kernel_size)
    np.testing.assert_allclose(np.asarray(eu2), np.asarray(re2), rtol=TOL, atol=TOL)
    np.testing.assert_allclose(np.asarray(ou2), np.asarray(ro2), rtol=TOL, atol=TOL)
    assert eu2.shape == (B2_, C, T2 // 2) and ou2.shape == (B2_, C, T2 // 2)

    # --- test 3: batch tile > 1 (exercises the batch-block-diagonal path) ----
    B3_, T3 = 4, 13
    x3 = jax.random.normal(kx3, (B3_, T3, C), jnp.float32)
    run3 = functools.partial(interactor_pallas, kernel_size=kernel_size)
    eu3, ou3 = jax.jit(run3)(x3, params)
    jax.block_until_ready((eu3, ou3))
    re3, ro3 = interactor_ref(x3, params, kernel_size=kernel_size)
    np.testing.assert_allclose(np.asarray(eu3), np.asarray(re3), rtol=TOL, atol=TOL)
    np.testing.assert_allclose(np.asarray(ou3), np.asarray(ro3), rtol=TOL, atol=TOL)
    assert eu3.shape == (B3_, C, (T3 + 1) // 2) and ou3.shape == (B3_, C, T3 // 2)

    print("KERNEL_OK")
</pallas_src>

<mosaic_0001>
module attributes {stable_mosaic.version = 11 : i64} {
  func.func @kernel(%arg0: i32, %arg1: memref<8x128xf32, #tpu.memory_space<vmem>>, %arg2: memref<5x8x8xf32, #tpu.memory_space<vmem>>, %arg3: memref<8x1xf32, #tpu.memory_space<vmem>>, %arg4: memref<3x8x8xf32, #tpu.memory_space<vmem>>, %arg5: memref<8x1xf32, #tpu.memory_space<vmem>>, %arg6: memref<5x8x8xf32, #tpu.memory_space<vmem>>, %arg7: memref<8x1xf32, #tpu.memory_space<vmem>>, %arg8: memref<3x8x8xf32, #tpu.memory_space<vmem>>, %arg9: memref<8x1xf32, #tpu.memory_space<vmem>>, %arg10: memref<8x128xf32, #tpu.memory_space<vmem>>) attributes {dimension_semantics = [#tpu.dimension_semantics<parallel>], iteration_bounds = array<i64: 2>, scalar_prefetch = 0 : i64, scratch_operands = 0 : i64, tpu.core_type = #tpu.core_type<tc>, window_params = [{transform_indices = @transform_0, window_bounds = array<i64: 8, 128>}, {pipeline_mode = #tpu.pipeline_mode<synchronous>, transform_indices = @transform_1, window_bounds = array<i64: 5, 8, 8>}, {pipeline_mode = #tpu.pipeline_mode<synchronous>, transform_indices = @transform_2, window_bounds = array<i64: 8, 1>}, {pipeline_mode = #tpu.pipeline_mode<synchronous>, transform_indices = @transform_3, window_bounds = array<i64: 3, 8, 8>}, {pipeline_mode = #tpu.pipeline_mode<synchronous>, transform_indices = @transform_4, window_bounds = array<i64: 8, 1>}, {pipeline_mode = #tpu.pipeline_mode<synchronous>, transform_indices = @transform_5, window_bounds = array<i64: 5, 8, 8>}, {pipeline_mode = #tpu.pipeline_mode<synchronous>, transform_indices = @transform_6, window_bounds = array<i64: 8, 1>}, {pipeline_mode = #tpu.pipeline_mode<synchronous>, transform_indices = @transform_7, window_bounds = array<i64: 3, 8, 8>}, {pipeline_mode = #tpu.pipeline_mode<synchronous>, transform_indices = @transform_8, window_bounds = array<i64: 8, 1>}, {transform_indices = @transform_9, window_bounds = array<i64: 8, 128>}]} {
    %c0 = arith.constant 0 : index
    %c0_0 = arith.constant 0 : index
    %0 = vector.load %arg1[%c0, %c0_0] : memref<8x128xf32, #tpu.memory_space<vmem>>, vector<8x128xf32>
    %c0_1 = arith.constant 0 : index
    %c0_2 = arith.constant 0 : index
    %c0_3 = arith.constant 0 : index
    %1 = vector.load %arg2[%c0_1, %c0_2, %c0_3] : memref<5x8x8xf32, #tpu.memory_space<vmem>>, vector<1x8x8xf32>
    %2 = vector.shape_cast %1 : vector<1x8x8xf32> to vector<8x8xf32>
    %cst = arith.constant dense<0.000000e+00> : vector<8x128xf32>
    %3 = tpu.matmul %2, %0, %cst {dimension_numbers = #tpu.dot_dimension_numbers<[1], [0], [0], [1], [0, 0, 1, 1], [], []>} : vector<8x8xf32>, vector<8x128xf32>, vector<8x128xf32> -> vector<8x128xf32>
    %c127_i32 = arith.constant 127 : i32
    %4 = tpu.dynamic_rotate %0 by %c127_i32 dim 1 : vector<8x128xf32>, i32 -> vector<8x128xf32>
    %c1 = arith.constant 1 : index
    %c0_4 = arith.constant 0 : index
    %c0_5 = arith.constant 0 : index
    %5 = vector.load %arg2[%c1, %c0_4, %c0_5] : memref<5x8x8xf32, #tpu.memory_space<vmem>>, vector<1x8x8xf32>
    %6 = vector.shape_cast %5 : vector<1x8x8xf32> to vector<8x8xf32>
    %cst_6 = arith.constant dense<0.000000e+00> : vector<8x128xf32>
    %7 = tpu.matmul %6, %4, %cst_6 {dimension_numbers = #tpu.dot_dimension_numbers<[1], [0], [0], [1], [0, 0, 1, 1], [], []>} : vector<8x8xf32>, vector<8x128xf32>, vector<8x128xf32> -> vector<8x128xf32>
    %8 = arith.addf %3, %7 : vector<8x128xf32>
    %c126_i32 = arith.constant 126 : i32
    %9 = tpu.dynamic_rotate %0 by %c126_i32 dim 1 : vector<8x128xf32>, i32 -> vector<8x128xf32>
    %c2 = arith.constant 2 : index
    %c0_7 = arith.constant 0 : index
    %c0_8 = arith.constant 0 : index
    %10 = vector.load %arg2[%c2, %c0_7, %c0_8] : memref<5x8x8xf32, #tpu.memory_space<vmem>>, vector<1x8x8xf32>
    %11 = vector.shape_cast %10 : vector<1x8x8xf32> to vector<8x8xf32>
    %cst_9 = arith.constant dense<0.000000e+00> : vector<8x128xf32>
    %12 = tpu.matmul %11, %9, %cst_9 {dimension_numbers = #tpu.dot_dimension_numbers<[1], [0], [0], [1], [0, 0, 1, 1], [], []>} : vector<8x8xf32>, vector<8x128xf32>, vector<8x128xf32> -> vector<8x128xf32>
    %13 = arith.addf %8, %12 : vector<8x128xf32>
    %c125_i32 = arith.constant 125 : i32
    %14 = tpu.dynamic_rotate %0 by %c125_i32 dim 1 : vector<8x128xf32>, i32 -> vector<8x128xf32>
    %c3 = arith.constant 3 : index
    %c0_10 = arith.constant 0 : index
    %c0_11 = arith.constant 0 : index
    %15 = vector.load %arg2[%c3, %c0_10, %c0_11] : memref<5x8x8xf32, #tpu.memory_space<vmem>>, vector<1x8x8xf32>
    %16 = vector.shape_cast %15 : vector<1x8x8xf32> to vector<8x8xf32>
    %cst_12 = arith.constant dense<0.000000e+00> : vector<8x128xf32>
    %17 = tpu.matmul %16, %14, %cst_12 {dimension_numbers = #tpu.dot_dimension_numbers<[1], [0], [0], [1], [0, 0, 1, 1], [], []>} : vector<8x8xf32>, vector<8x128xf32>, vector<8x128xf32> -> vector<8x128xf32>
    %18 = arith.addf %13, %17 : vector<8x128xf32>
    %c124_i32 = arith.constant 124 : i32
    %19 = tpu.dynamic_rotate %0 by %c124_i32 dim 1 : vector<8x128xf32>, i32 -> vector<8x128xf32>
    %c4 = arith.constant 4 : index
    %c0_13 = arith.constant 0 : index
    %c0_14 = arith.constant 0 : index
    %20 = vector.load %arg2[%c4, %c0_13, %c0_14] : memref<5x8x8xf32, #tpu.memory_space<vmem>>, vector<1x8x8xf32>
    %21 = vector.shape_cast %20 : vector<1x8x8xf32> to vector<8x8xf32>
    %cst_15 = arith.constant dense<0.000000e+00> : vector<8x128xf32>
    %22 = tpu.matmul %21, %19, %cst_15 {dimension_numbers = #tpu.dot_dimension_numbers<[1], [0], [0], [1], [0, 0, 1, 1], [], []>} : vector<8x8xf32>, vector<8x128xf32>, vector<8x128xf32> -> vector<8x128xf32>
    %23 = arith.addf %18, %22 : vector<8x128xf32>
    %c0_16 = arith.constant 0 : index
    %c0_17 = arith.constant 0 : index
    %24 = vector.load %arg3[%c0_16, %c0_17] : memref<8x1xf32, #tpu.memory_space<vmem>>, vector<8x1xf32>
    %25 = vector.broadcast %24 : vector<8x1xf32> to vector<8x128xf32>
    %26 = arith.addf %23, %25 : vector<8x128xf32>
    %cst_18 = arith.constant 0.000000e+00 : f32
    %27 = vector.broadcast %cst_18 : f32 to vector<8x128xf32>
    %28 = arith.cmpf ogt, %26, %27 : vector<8x128xf32>
    %cst_19 = arith.constant 0.00999999977 : f32
    %29 = vector.broadcast %cst_19 : f32 to vector<8x128xf32>
    %30 = arith.mulf %29, %26 : vector<8x128xf32>
    %31 = arith.select %28, %26, %30 : vector<8x128xi1>, vector<8x128xf32>
    %c0_20 = arith.constant 0 : index
    %c0_21 = arith.constant 0 : index
    %c0_22 = arith.constant 0 : index
    %32 = vector.load %arg4[%c0_20, %c0_21, %c0_22] : memref<3x8x8xf32, #tpu.memory_space<vmem>>, vector<1x8x8xf32>
    %33 = vector.shape_cast %32 : vector<1x8x8xf32> to vector<8x8xf32>
    %cst_23 = arith.constant dense<0.000000e+00> : vector<8x128xf32>
    %34 = tpu.matmul %33, %31, %cst_23 {dimension_numbers = #tpu.dot_dimension_numbers<[1], [0], [0], [1], [0, 0, 1, 1], [], []>} : vector<8x8xf32>, vector<8x128xf32>, vector<8x128xf32> -> vector<8x128xf32>
    %c127_i32_24 = arith.constant 127 : i32
    %35 = tpu.dynamic_rotate %31 by %c127_i32_24 dim 1 : vector<8x128xf32>, i32 -> vector<8x128xf32>
    %c1_25 = arith.constant 1 : index
    %c0_26 = arith.constant 0 : index
    %c0_27 = arith.constant 0 : index
    %36 = vector.load %arg4[%c1_25, %c0_26, %c0_27] : memref<3x8x8xf32, #tpu.memory_space<vmem>>, vector<1x8x8xf32>
    %37 = vector.shape_cast %36 : vector<1x8x8xf32> to vector<8x8xf32>
    %cst_28 = arith.constant dense<0.000000e+00> : vector<8x128xf32>
    %38 = tpu.matmul %37, %35, %cst_28 {dimension_numbers = #tpu.dot_dimension_numbers<[1], [0], [0], [1], [0, 0, 1, 1], [], []>} : vector<8x8xf32>, vector<8x128xf32>, vector<8x128xf32> -> vector<8x128xf32>
    %39 = arith.addf %34, %38 : vector<8x128xf32>
    %c126_i32_29 = arith.constant 126 : i32
    %40 = tpu.dynamic_rotate %31 by %c126_i32_29 dim 1 : vector<8x128xf32>, i32 -> vector<8x128xf32>
    %c2_30 = arith.constant 2 : index
    %c0_31 = arith.constant 0 : index
    %c0_32 = arith.constant 0 : index
    %41 = vector.load %arg4[%c2_30, %c0_31, %c0_32] : memref<3x8x8xf32, #tpu.memory_space<vmem>>, vector<1x8x8xf32>
    %42 = vector.shape_cast %41 : vector<1x8x8xf32> to vector<8x8xf32>
    %cst_33 = arith.constant dense<0.000000e+00> : vector<8x128xf32>
    %43 = tpu.matmul %42, %40, %cst_33 {dimension_numbers = #tpu.dot_dimension_numbers<[1], [0], [0], [1], [0, 0, 1, 1], [], []>} : vector<8x8xf32>, vector<8x128xf32>, vector<8x128xf32> -> vector<8x128xf32>
    %44 = arith.addf %39, %43 : vector<8x128xf32>
    %c0_34 = arith.constant 0 : index
    %c0_35 = arith.constant 0 : index
    %45 = vector.load %arg5[%c0_34, %c0_35] : memref<8x1xf32, #tpu.memory_space<vmem>>, vector<8x1xf32>
    %46 = vector.broadcast %45 : vector<8x1xf32> to vector<8x128xf32>
    %47 = arith.addf %44, %46 : vector<8x128xf32>
    %48 = math.tanh %47 : vector<8x128xf32>
    %c125_i32_36 = arith.constant 125 : i32
    %49 = tpu.dynamic_rotate %0 by %c125_i32_36 dim 1 : vector<8x128xf32>, i32 -> vector<8x128xf32>
    %50 = math.exp %48 : vector<8x128xf32>
    %51 = arith.mulf %49, %50 : vector<8x128xf32>
    %52 = tpu.iota {dimensions = array<i32: 1>} : vector<1x128xi32>
    %53 = vector.extract_strided_slice %51 {offsets = [0, 8], sizes = [8, 1], strides = [1, 1]} : vector<8x128xf32> to vector<8x1xf32>
    %54 = vector.shape_cast %53 : vector<8x1xf32> to vector<8x1xf32>
    %55 = vector.broadcast %54 : vector<8x1xf32> to vector<8x128xf32>
    %56 = vector.extract_strided_slice %51 {offsets = [0, 0], sizes = [8, 1], strides = [1, 1]} : vector<8x128xf32> to vector<8x1xf32>
    %57 = vector.shape_cast %56 : vector<8x1xf32> to vector<8x1xf32>
    %58 = vector.broadcast %57 : vector<8x1xf32> to vector<8x128xf32>
    %c9_i32 = arith.constant 9 : i32
    %59 = vector.broadcast %c9_i32 : i32 to vector<1x128xi32>
    %60 = arith.cmpi sge, %52, %59 : vector<1x128xi32>
    %61 = vector.shape_cast %60 : vector<1x128xi1> to vector<1x128xi1>
    %62 = vector.broadcast %61 : vector<1x128xi1> to vector<8x128xi1>
    %63 = arith.select %62, %55, %51 : vector<8x128xi1>, vector<8x128xf32>
    %c3_i32 = arith.constant 3 : i32
    %64 = tpu.dynamic_rotate %63 by %c3_i32 dim 1 : vector<8x128xf32>, i32 -> vector<8x128xf32>
    %c3_i32_37 = arith.constant 3 : i32
    %65 = vector.broadcast %c3_i32_37 : i32 to vector<1x128xi32>
    %66 = arith.cmpi slt, %52, %65 : vector<1x128xi32>
    %67 = vector.shape_cast %66 : vector<1x128xi1> to vector<1x128xi1>
    %68 = vector.broadcast %67 : vector<1x128xi1> to vector<8x128xi1>
    %69 = arith.select %68, %58, %64 : vector<8x128xi1>, vector<8x128xf32>
    %c0_38 = arith.constant 0 : index
    %c0_39 = arith.constant 0 : index
    %c0_40 = arith.constant 0 : index
    %70 = vector.load %arg6[%c0_38, %c0_39, %c0_40] : memref<5x8x8xf32, #tpu.memory_space<vmem>>, vector<1x8x8xf32>
    %71 = vector.shape_cast %70 : vector<1x8x8xf32> to vector<8x8xf32>
    %cst_41 = arith.constant dense<0.000000e+00> : vector<8x128xf32>
    %72 = tpu.matmul %71, %69, %cst_41 {dimension_numbers = #tpu.dot_dimension_numbers<[1], [0], [0], [1], [0, 0, 1, 1], [], []>} : vector<8x8xf32>, vector<8x128xf32>, vector<8x128xf32> -> vector<8x128xf32>
    %c127_i32_42 = arith.constant 127 : i32
    %73 = tpu.dynamic_rotate %69 by %c127_i32_42 dim 1 : vector<8x128xf32>, i32 -> vector<8x128xf32>
    %c1_43 = arith.constant 1 : index
    %c0_44 = arith.constant 0 : index
    %c0_45 = arith.constant 0 : index
    %74 = vector.load %arg6[%c1_43, %c0_44, %c0_45] : memref<5x8x8xf32, #tpu.memory_space<vmem>>, vector<1x8x8xf32>
    %75 = vector.shape_cast %74 : vector<1x8x8xf32> to vector<8x8xf32>
    %cst_46 = arith.constant dense<0.000000e+00> : vector<8x128xf32>
    %76 = tpu.matmul %75, %73, %cst_46 {dimension_numbers = #tpu.dot_dimension_numbers<[1], [0], [0], [1], [0, 0, 1, 1], [], []>} : vector<8x8xf32>, vector<8x128xf32>, vector<8x128xf32> -> vector<8x128xf32>
    %77 = arith.addf %72, %76 : vector<8x128xf32>
    %c126_i32_47 = arith.constant 126 : i32
    %78 = tpu.dynamic_rotate %69 by %c126_i32_47 dim 1 : vector<8x128xf32>, i32 -> vector<8x128xf32>
    %c2_48 = arith.constant 2 : index
    %c0_49 = arith.constant 0 : index
    %c0_50 = arith.constant 0 : index
    %79 = vector.load %arg6[%c2_48, %c0_49, %c0_50] : memref<5x8x8xf32, #tpu.memory_space<vmem>>, vector<1x8x8xf32>
    %80 = vector.shape_cast %79 : vector<1x8x8xf32> to vector<8x8xf32>
    %cst_51 = arith.constant dense<0.000000e+00> : vector<8x128xf32>
    %81 = tpu.matmul %80, %78, %cst_51 {dimension_numbers = #tpu.dot_dimension_numbers<[1], [0], [0], [1], [0, 0, 1, 1], [], []>} : vector<8x8xf32>, vector<8x128xf32>, vector<8x128xf32> -> vector<8x128xf32>
    %82 = arith.addf %77, %81 : vector<8x128xf32>
    %c125_i32_52 = arith.constant 125 : i32
    %83 = tpu.dynamic_rotate %69 by %c125_i32_52 dim 1 : vector<8x128xf32>, i32 -> vector<8x128xf32>
    %c3_53 = arith.constant 3 : index
    %c0_54 = arith.constant 0 : index
    %c0_55 = arith.constant 0 : index
    %84 = vector.load %arg6[%c3_53, %c0_54, %c0_55] : memref<5x8x8xf32, #tpu.memory_space<vmem>>, vector<1x8x8xf32>
    %85 = vector.shape_cast %84 : vector<1x8x8xf32> to vector<8x8xf32>
    %cst_56 = arith.constant dense<0.000000e+00> : vector<8x128xf32>
    %86 = tpu.matmul %85, %83, %cst_56 {dimension_numbers = #tpu.dot_dimension_numbers<[1], [0], [0], [1], [0, 0, 1, 1], [], []>} : vector<8x8xf32>, vector<8x128xf32>, vector<8x128xf32> -> vector<8x128xf32>
    %87 = arith.addf %82, %86 : vector<8x128xf32>
    %c124_i32_57 = arith.constant 124 : i32
    %88 = tpu.dynamic_rotate %69 by %c124_i32_57 dim 1 : vector<8x128xf32>, i32 -> vector<8x128xf32>
    %c4_58 = arith.constant 4 : index
    %c0_59 = arith.constant 0 : index
    %c0_60 = arith.constant 0 : index
    %89 = vector.load %arg6[%c4_58, %c0_59, %c0_60] : memref<5x8x8xf32, #tpu.memory_space<vmem>>, vector<1x8x8xf32>
    %90 = vector.shape_cast %89 : vector<1x8x8xf32> to vector<8x8xf32>
    %cst_61 = arith.constant dense<0.000000e+00> : vector<8x128xf32>
    %91 = tpu.matmul %90, %88, %cst_61 {dimension_numbers = #tpu.dot_dimension_numbers<[1], [0], [0], [1], [0, 0, 1, 1], [], []>} : vector<8x8xf32>, vector<8x128xf32>, vector<8x128xf32> -> vector<8x128xf32>
    %92 = arith.addf %87, %91 : vector<8x128xf32>
    %c0_62 = arith.constant 0 : index
    %c0_63 = arith.constant 0 : index
    %93 = vector.load %arg7[%c0_62, %c0_63] : memref<8x1xf32, #tpu.memory_space<vmem>>, vector<8x1xf32>
    %94 = vector.broadcast %93 : vector<8x1xf32> to vector<8x128xf32>
    %95 = arith.addf %92, %94 : vector<8x128xf32>
    %cst_64 = arith.constant 0.000000e+00 : f32
    %96 = vector.broadcast %cst_64 : f32 to vector<8x128xf32>
    %97 = arith.cmpf ogt, %95, %96 : vector<8x128xf32>
    %cst_65 = arith.constant 0.00999999977 : f32
    %98 = vector.broadcast %cst_65 : f32 to vector<8x128xf32>
    %99 = arith.mulf %98, %95 : vector<8x128xf32>
    %100 = arith.select %97, %95, %99 : vector<8x128xi1>, vector<8x128xf32>
    %c0_66 = arith.constant 0 : index
    %c0_67 = arith.constant 0 : index
    %c0_68 = arith.constant 0 : index
    %101 = vector.load %arg8[%c0_66, %c0_67, %c0_68] : memref<3x8x8xf32, #tpu.memory_space<vmem>>, vector<1x8x8xf32>
    %102 = vector.shape_cast %101 : vector<1x8x8xf32> to vector<8x8xf32>
    %cst_69 = arith.constant dense<0.000000e+00> : vector<8x128xf32>
    %103 = tpu.matmul %102, %100, %cst_69 {dimension_numbers = #tpu.dot_dimension_numbers<[1], [0], [0], [1], [0, 0, 1, 1], [], []>} : vector<8x8xf32>, vector<8x128xf32>, vector<8x128xf32> -> vector<8x128xf32>
    %c127_i32_70 = arith.constant 127 : i32
    %104 = tpu.dynamic_rotate %100 by %c127_i32_70 dim 1 : vector<8x128xf32>, i32 -> vector<8x128xf32>
    %c1_71 = arith.constant 1 : index
    %c0_72 = arith.constant 0 : index
    %c0_73 = arith.constant 0 : index
    %105 = vector.load %arg8[%c1_71, %c0_72, %c0_73] : memref<3x8x8xf32, #tpu.memory_space<vmem>>, vector<1x8x8xf32>
    %106 = vector.shape_cast %105 : vector<1x8x8xf32> to vector<8x8xf32>
    %cst_74 = arith.constant dense<0.000000e+00> : vector<8x128xf32>
    %107 = tpu.matmul %106, %104, %cst_74 {dimension_numbers = #tpu.dot_dimension_numbers<[1], [0], [0], [1], [0, 0, 1, 1], [], []>} : vector<8x8xf32>, vector<8x128xf32>, vector<8x128xf32> -> vector<8x128xf32>
    %108 = arith.addf %103, %107 : vector<8x128xf32>
    %c126_i32_75 = arith.constant 126 : i32
    %109 = tpu.dynamic_rotate %100 by %c126_i32_75 dim 1 : vector<8x128xf32>, i32 -> vector<8x128xf32>
    %c2_76 = arith.constant 2 : index
    %c0_77 = arith.constant 0 : index
    %c0_78 = arith.constant 0 : index
    %110 = vector.load %arg8[%c2_76, %c0_77, %c0_78] : memref<3x8x8xf32, #tpu.memory_space<vmem>>, vector<1x8x8xf32>
    %111 = vector.shape_cast %110 : vector<1x8x8xf32> to vector<8x8xf32>
    %cst_79 = arith.constant dense<0.000000e+00> : vector<8x128xf32>
    %112 = tpu.matmul %111, %109, %cst_79 {dimension_numbers = #tpu.dot_dimension_numbers<[1], [0], [0], [1], [0, 0, 1, 1], [], []>} : vector<8x8xf32>, vector<8x128xf32>, vector<8x128xf32> -> vector<8x128xf32>
    %113 = arith.addf %108, %112 : vector<8x128xf32>
    %c0_80 = arith.constant 0 : index
    %c0_81 = arith.constant 0 : index
    %114 = vector.load %arg9[%c0_80, %c0_81] : memref<8x1xf32, #tpu.memory_space<vmem>>, vector<8x1xf32>
    %115 = vector.broadcast %114 : vector<8x1xf32> to vector<8x128xf32>
    %116 = arith.addf %113, %115 : vector<8x128xf32>
    %117 = math.tanh %116 : vector<8x128xf32>
    %118 = arith.addf %51, %117 : vector<8x128xf32>
    %c0_82 = arith.constant 0 : index
    %c0_83 = arith.constant 0 : index
    %119 = vector.load %arg10[%c0_82, %c0_83] : memref<8x128xf32, #tpu.memory_space<vmem>>, vector<8x128xf32>
    tpu.vector_store %arg10[%c0_82, %c0_83], %118 {strides = array<i32>} : memref<8x128xf32, #tpu.memory_space<vmem>>, vector<8x128xf32>,
    return
  }
  func.func @transform_0(%arg0: i32) -> (i32, i32) {
    %c0_i32 = arith.constant 0 : i32
    %c0_i32_0 = arith.constant 0 : i32
    return %arg0, %c0_i32 : i32, i32
  }
  func.func @transform_1(%arg0: i32) -> (i32, i32, i32) {
    %c0_i32 = arith.constant 0 : i32
    %c0_i32_0 = arith.constant 0 : i32
    %c0_i32_1 = arith.constant 0 : i32
    %c0_i32_2 = arith.constant 0 : i32
    return %c0_i32, %c0_i32_0, %c0_i32_1 : i32, i32, i32
  }
  func.func @transform_2(%arg0: i32) -> (i32, i32) {
    %c0_i32 = arith.constant 0 : i32
    %c0_i32_0 = arith.constant 0 : i32
    %c0_i32_1 = arith.constant 0 : i32
    return %c0_i32, %c0_i32_0 : i32, i32
  }
  func.func @transform_3(%arg0: i32) -> (i32, i32, i32) {
    %c0_i32 = arith.constant 0 : i32
    %c0_i32_0 = arith.constant 0 : i32
    %c0_i32_1 = arith.constant 0 : i32
    %c0_i32_2 = arith.constant 0 : i32
    return %c0_i32, %c0_i32_0, %c0_i32_1 : i32, i32, i32
  }
  func.func @transform_4(%arg0: i32) -> (i32, i32) {
    %c0_i32 = arith.constant 0 : i32
    %c0_i32_0 = arith.constant 0 : i32
    %c0_i32_1 = arith.constant 0 : i32
    return %c0_i32, %c0_i32_0 : i32, i32
  }
  func.func @transform_5(%arg0: i32) -> (i32, i32, i32) {
    %c0_i32 = arith.constant 0 : i32
    %c0_i32_0 = arith.constant 0 : i32
    %c0_i32_1 = arith.constant 0 : i32
    %c0_i32_2 = arith.constant 0 : i32
    return %c0_i32, %c0_i32_0, %c0_i32_1 : i32, i32, i32
  }
  func.func @transform_6(%arg0: i32) -> (i32, i32) {
    %c0_i32 = arith.constant 0 : i32
    %c0_i32_0 = arith.constant 0 : i32
    %c0_i32_1 = arith.constant 0 : i32
    return %c0_i32, %c0_i32_0 : i32, i32
  }
  func.func @transform_7(%arg0: i32) -> (i32, i32, i32) {
    %c0_i32 = arith.constant 0 : i32
    %c0_i32_0 = arith.constant 0 : i32
    %c0_i32_1 = arith.constant 0 : i32
    %c0_i32_2 = arith.constant 0 : i32
    return %c0_i32, %c0_i32_0, %c0_i32_1 : i32, i32, i32
  }
  func.func @transform_8(%arg0: i32) -> (i32, i32) {
    %c0_i32 = arith.constant 0 : i32
    %c0_i32_0 = arith.constant 0 : i32
    %c0_i32_1 = arith.constant 0 : i32
    return %c0_i32, %c0_i32_0 : i32, i32
  }
  func.func @transform_9(%arg0: i32) -> (i32, i32) {
    %c0_i32 = arith.constant 0 : i32
    %c0_i32_0 = arith.constant 0 : i32
    return %arg0, %c0_i32 : i32, i32
  }
}

</mosaic_0001>

<bundles_post_ra>
// kernel: interactor_pallas.1
= control target key start
LH: loop header
LB: loop body
LE: loop exit
PB: predicated region body
PF: predicated region fallthrough
CT: control target
= control target key end

     0   :  { %s1915_s30 = smov 0   ;;  %s2087_s0 = inlined_call_operand.vmem [shape: f32[16,128], index: 0, kind: input, shape index: {}]   ;;  %s2088_s1 = inlined_call_operand.vmem [shape: f32[5,8,8], index: 1, kind: input, shape index: {}]   ;;  %s2089_s2 = inlined_call_operand.vmem [shape: f32[8,1], index: 2, kind: input, shape index: {}]   ;;  %s2090_s3 = inlined_call_operand.vmem [shape: f32[3,8,8], index: 3, kind: input, shape index: {}]   ;;  %s2091_s4 = inlined_call_operand.vmem [shape: f32[8,1], index: 4, kind: input, shape index: {}]   ;;  %s2092_s5 = inlined_call_operand.vmem [shape: f32[5,8,8], index: 5, kind: input, shape index: {}]   ;;  %s2093_s6 = inlined_call_operand.vmem [shape: f32[8,1], index: 6, kind: input, shape index: {}]   ;;  %s2094_s7 = inlined_call_operand.vmem [shape: f32[3,8,8], index: 7, kind: input, shape index: {}]   ;;  %s2095_s8 = inlined_call_operand.vmem [shape: f32[8,1], index: 8, kind: input, shape index: {}]   ;;  %s2096_s9 = inlined_call_operand.vmem [shape: f32[16,128], index: 9, kind: output, shape index: {}]  }
   0x1 LB: > { %s1673_s10 = sadd.s32 4294967295, %s1854_s30   ;;  %p1677_p0 = scmp.ge.s32.totalorder %s1854_s30, 1  ;;  %s1854_s30 = sphi %s1915_s30, %s19_s30  }
   0x2   : > { %p286_p1 = scmp.lt.s32.totalorder %s1854_s30, 3 }
   0x4   : > { %p287_p2 = pnand %p1677_p0, %p286_p1 }
   0x5   : > { %p320_p3 = scmp.lt.s32.totalorder (!%p287_p2), %s1673_s10, 1  ;;  %s1859_s17 = smov (!%p287_p2), 127  }
   0x6   : > { %290 = sbr.rel (%p287_p2) target bundleno = 1587 (0x633), region = 56  ;;  %s1860_s18 = smov (!%p287_p2), 125  }
   0x7   : > { %s1861_s19 = smov (!%p287_p2), 126   ;;  %s1862_s20 = smov (!%p287_p2), 124  }
   0x8   : > { %s1864_s25 = smov (!%p287_p2), 3  }
   0xb   : > { %v1856_v0 = vmov 0.0   ;;  %s2098_s10 = smov (!%p320_p3, %s1673_s10), 1  ;;  %vm1857_vm0 = vmmov 0   ;;  %v1858_v1 = vmov 0   ;;  %vm334_vm1 = vcmask 64512   ;;  %v329_v3 = vld [vmem:[%s2088_s1] sm:$0xff] }
   0xc   : > { %1742 = vmatprep.subr.mxu0 %v1856_v0  ;;  %1747 = vmatprep.subr.mxu1 %v1856_v0  ;;  %s1678_s11 = sshll.u32 %s2098_s10, 3  ;;  %v715_v4 = vld [vmem:[%s2089_s2] sm:$0xff]  ;;  %v1680_v6 = vld [vmem:[%s2088_s1 + $0x8] sm:$0xff]  ;;  %v1685_v9 = vld [vmem:[%s2088_s1 + $0x18] sm:$0xff]  ;;  %v1863_v39 = vmov 8   ;;  %v965_v52 = vlaneseq }
   0xd   : > { %1744 = vmatprep.mubr.msk.f32.mxu0 %vm1857_vm0, %v1856_v0  ;;  %1749 = vmatprep.mubr.msk.f32.mxu1 %vm1857_vm0, %v1856_v0  ;;  %s323_s14 = scalar_lea.vmem %s2087_s0, %s1678_s11  ;;  %v954_v5 = vld [vmem:[%s2091_s4] sm:$0xff]  ;;  %v1683_v10 = vld [vmem:[%s2088_s1 + $0x10] sm:$0xff]  ;;  %v1689_v33 = vld [vmem:[%s2090_s3 + $0x8] sm:$0xff]  ;;  %s327_s12 = scalar_lea.vmem %s2096_s9, %s1678_s11 }
   0xe   : > { %1839 = vset.pattern.permute.xlu0 %v1858_v1  ;;  %v328_v2 = vld [vmem:[%s323_s14] sm:$0xff]  ;;  %v1692_v35 = vld [vmem:[%s2090_s3 + $0x10] sm:$0xff]  ;;  %1840 = vset.pattern.permute.xlu1 %v1863_v39  ;;  %v966_v53 = vand.u32 127, %v965_v52  ;;  %v1694_v61 = vld [vmem:[%s2092_s5 + $0x8] sm:$0xff] }
   0xf   : > { %330 = vrot.lane.b32.xlu0 %v328_v2, %s1859_s17  ;;  %559 = vrot.lane.b32.xlu1 %v328_v2, %s1860_s18  ;;  %v1687_v13 = vld [vmem:[%s2088_s1 + $0x20] sm:$0xff] }
  0x10   : > { %1748 = vmatpush3.msra.mxu1 %v328_v2  ;;  %v725_v31 = vld [vmem:[%s2090_s3] sm:$0xff]  ;;  %vm976_vm3 = vcmp.ge.s32.totalorder %v966_v53, 9  ;;  %vm982_vm4 = vcmp.lt.s32.totalorder %v966_v53, 3 }
  0x11   : > { %1750 = vmatmul.mubr.msk.f32.vlgmr.msra.gmra.mxu1 %vm334_vm1, %v329_v3  ;;  %1757 = vmatprep.subr.mxu1 %v1856_v0  ;;  %v986_v59 = vld [vmem:[%s2092_s5] sm:$0xff] }
  0x12   : > { %1759 = vmatprep.mubr.msk.f32.mxu1 %vm1857_vm0, %v1856_v0  ;;  %v1371_v60 = vld [vmem:[%s2093_s6] sm:$0xff] }
  0x13   : > { %481 = vrot.lane.b32.xlu0 %v328_v2, %s1861_s19  ;;  %637 = vrot.lane.b32.xlu1 %v328_v2, %s1862_s20  ;;  %v1699_v2 = vld [vmem:[%s2092_s5 + $0x18] sm:$0xff] }
  0x17   : > { %718 = vperm.xlu0 %1839, %v715_v4  }
  0x1b   : > { %957 = vperm.xlu0 %1839, %v954_v5   ;;  %v1701_v5 = vld [vmem:[%s2092_s5 + $0x20] sm:$0xff] }
  0x81   : > { %v331_v7 = vpop.permute.xlu0 %330  ;;  %v1958_v8 = vpop.permute.xlu1 %559 }
  0x82   : > { %1743 = vmatpush3.msra.mxu0 %v331_v7  ;;  %1758 = vmatpush3.msra.mxu1 %v1958_v8 }
  0x83   : > { %1745 = vmatmul.mubr.msk.f32.vlgmr.msra.gmra.mxu0 %vm334_vm1, %v1680_v6  ;;  %1752 = vmatprep.subr.mxu0 %v1856_v0 }
  0x84   : > { %1754 = vmatprep.mubr.msk.f32.mxu0 %vm1857_vm0, %v1856_v0  ;;  %1760 = vmatmul.mubr.msk.f32.vlgmr.msra.gmra.mxu1 %vm334_vm1, %v1685_v9 }
  0x85   : > { %v482_v11 = vpop.permute.xlu0 %481  ;;  %v638_v12 = vpop.permute.xlu1 %637  ;;  %1767 = vmatprep.subr.mxu1 %v1856_v0  ;;  %1769 = vmatprep.mubr.msk.f32.mxu1 %vm1857_vm0, %v1856_v0 }
  0x86   : > { %1753 = vmatpush3.msra.mxu0 %v482_v11 }
  0x87   : > { %1755 = vmatmul.mubr.msk.f32.vlgmr.msra.gmra.mxu0 %vm334_vm1, %v1683_v10  ;;  %1762 = vmatprep.subr.mxu0 %v1856_v0 }
  0x88   : > { %1763 = vmatpush3.msra.mxu0 %v638_v12  ;;  %1764 = vmatprep.mubr.msk.f32.mxu0 %vm1857_vm0, %v1856_v0 }
  0x89   : > { %1772 = vmatprep.subr.mxu0 %v1856_v0 }
  0x8b   : > { %1765 = vmatmul.mubr.msk.f32.vlgmr.msra.gmra.mxu0 %vm334_vm1, %v1687_v13 }
  0x8c   : > { %1774 = vmatprep.mubr.msk.f32.mxu0 %vm1857_vm0, %v1856_v0 }
  0x92   : > { %v719_v27 = vpop.permute.xlu0 %718 }
  0x96   : > { %v958_v45 = vpop.permute.xlu0 %957 }
  0xd1   : > { %v477_v14 = vpop.f32.mrf.mxu1 }
  0xd3   : > { %v1751_v15 = vpop.f32.mrf.mxu1 }
 0x143   : > { %v404_v16 = vpop.f32.mrf.mxu0 }
 0x144   : > { %v632_v17 = vpop.f32.mrf.mxu1  ;;  %v478_v19 = vadd.f32 %v477_v14, %v404_v16 }
 0x145   : > { %v1746_v18 = vpop.f32.mrf.mxu0 }
 0x146   : > { %v1761_v20 = vpop.f32.mrf.mxu1 }
 0x147   : > { %v554_v21 = vpop.f32.mrf.mxu0 }
 0x148   : > { %v558_v22 = vadd.f32 %v554_v21, %v478_v19 }
 0x149   : > { %v1756_v23 = vpop.f32.mrf.mxu0 }
 0x14a   : > { %v636_v24 = vadd.f32 %v632_v17, %v558_v22 }
 0x14b   : > { %v710_v25 = vpop.f32.mrf.mxu0 }
 0x14c   : > { %v714_v26 = vadd.f32 %v710_v25, %v636_v24  ;;  %v1381_v24 = vld [vmem:[%s2094_s7] sm:$0xff] }
 0x14d   : > { %v1766_v28 = vpop.f32.mrf.mxu0  ;;  %v1610_v25 = vld [vmem:[%s2095_s8] sm:$0xff] }
 0x14e   : > { %v721_v29 = vadd.f32 %v719_v27, %v714_v26  ;;  %v1703_v26 = vld [vmem:[%s2094_s7 + $0x8] sm:$0xff] }
 0x150   : > { %vm722_vm2 = vcmp.gt.f32.partialorder %v721_v29, 0.0  ;;  %v723_v30 = vmul.f32 0.01, %v721_v29 }
 0x152   : > { %v724_v32 = vsel %vm722_vm2, %v721_v29, %v723_v30  ;;  %v1706_v29 = vld [vmem:[%s2094_s7 + $0x10] sm:$0xff] }
 0x153   : > { %726 = vrot.lane.b32.xlu1 %v724_v32, %s1859_s17  ;;  %1773 = vmatpush3.msra.mxu0 %v724_v32 }
 0x154   : > { %1775 = vmatmul.mubr.msk.f32.vlgmr.msra.gmra.mxu0 %vm334_vm1, %v725_v31  ;;  %1782 = vmatprep.subr.mxu0 %v1856_v0 }
 0x155   : > { %1784 = vmatprep.mubr.msk.f32.mxu0 %vm1857_vm0, %v1856_v0 }
 0x157   : > { %876 = vrot.lane.b32.xlu1 %v724_v32, %s1861_s19 }
 0x1c5   : > { %v727_v34 = vpop.permute.xlu1 %726 }
 0x1c6   : > { %1768 = vmatpush3.msra.mxu1 %v727_v34 }
 0x1c7   : > { %1770 = vmatmul.mubr.msk.f32.vlgmr.msra.gmra.mxu1 %vm334_vm1, %v1689_v33  ;;  %1777 = vmatprep.subr.mxu1 %v1856_v0 }
 0x1c8   : > { %1779 = vmatprep.mubr.msk.f32.mxu1 %vm1857_vm0, %v1856_v0 }
 0x1c9   : > { %v877_v36 = vpop.permute.xlu1 %876 }
 0x1ca   : > { %1778 = vmatpush3.msra.mxu1 %v877_v36 }
 0x1cb   : > { %1780 = vmatmul.mubr.msk.f32.vlgmr.msra.gmra.mxu1 %vm334_vm1, %v1692_v35  ;;  %1787 = vmatprep.subr.mxu1 %v1856_v0 }
 0x1cc   : > { %1789 = vmatprep.mubr.msk.f32.mxu1 %vm1857_vm0, %v1856_v0 }
 0x214   : > { %v872_v37 = vpop.f32.mrf.mxu0 }
 0x216   : > { %v1776_v38 = vpop.f32.mrf.mxu0 }
 0x287   : > { %v799_v40 = vpop.f32.mrf.mxu1 }
 0x288   : > { %v873_v42 = vadd.f32 %v872_v37, %v799_v40 }
 0x289   : > { %v1771_v41 = vpop.f32.mrf.mxu1 }
 0x28b   : > { %v949_v43 = vpop.f32.mrf.mxu1 }
 0x28c   : > { %v953_v44 = vadd.f32 %v949_v43, %v873_v42 }
 0x28d   : > { %v1781_v46 = vpop.f32.mrf.mxu1 }
 0x28e   : > { %v960_v47 = vadd.f32 %v958_v45, %v953_v44 }
 0x290   : > { %1842 = vtanh.f32 %v960_v47 }
 0x29d   : > { %v1843_v48 = vpop.eup %1842 }
 0x29e   : > { %v962_v49 = vmul.f32 1.442695, %v1843_v48 }
 0x2a0   : > { %1844 = vpow2.f32 %v962_v49 }
 0x2ad   : > { %v1845_v50 = vpop.eup %1844 }
 0x2ae   : > { %v2010_v51 = vmul.f32 %v1845_v50, %v1958_v8 }
 0x2b0   : > { %973 = vperm.xlu0 %1839, %v2010_v51   ;;  %969 = vperm.xlu1 %1840, %v2010_v51  }
 0x2b4   : > { %1841 = vset.pattern.permute.xlu1 %v1858_v1  ;;  %v1697_v1 = vld [vmem:[%s2092_s5 + $0x10] sm:$0xff] }
 0x32b   : > { %v970_v54 = vpop.permute.xlu1 %969  ;;  %v974_v56 = vpop.permute.xlu0 %973 }
 0x32c   : > { %v979_v55 = vsel %vm976_vm3, %v970_v54, %v2010_v51 }
 0x32d   : > { %980 = vrot.lane.b32.xlu1 %v979_v55, %s1864_s25 }
 0x39f   : > { %v981_v57 = vpop.permute.xlu1 %980 }
 0x3a0   : > { %v985_v58 = vsel %vm982_vm4, %v974_v56, %v981_v57 }
 0x3a1   : > { %1137 = vrot.lane.b32.xlu1 %v985_v58, %s1861_s19  ;;  %987 = vrot.lane.b32.xlu0 %v985_v58, %s1859_s17 }
 0x3a2   : > { %1788 = vmatpush3.msra.mxu1 %v985_v58 }
 0x3a3   : > { %1790 = vmatmul.mubr.msk.f32.vlgmr.msra.gmra.mxu1 %vm334_vm1, %v986_v59  ;;  %1797 = vmatprep.subr.mxu1 %v1856_v0 }
 0x3a4   : > { %1799 = vmatprep.mubr.msk.f32.mxu1 %vm1857_vm0, %v1856_v0 }
 0x3a5   : > { %1293 = vrot.lane.b32.xlu1 %v985_v58, %s1862_s20  ;;  %1215 = vrot.lane.b32.xlu0 %v985_v58, %s1860_s18 }
 0x3a9   : > { %1374 = vperm.xlu0 %1839, %v1371_v60  }
 0x413   : > { %v1138_v62 = vpop.permute.xlu1 %1137  ;;  %v988_v63 = vpop.permute.xlu0 %987 }
 0x414   : > { %1783 = vmatpush3.msra.mxu0 %v988_v63 }
 0x415   : > { %1785 = vmatmul.mubr.msk.f32.vlgmr.msra.gmra.mxu0 %vm334_vm1, %v1694_v61  ;;  %1792 = vmatprep.subr.mxu0 %v1856_v0 }
 0x416   : > { %1793 = vmatpush3.msra.mxu0 %v1138_v62  ;;  %1794 = vmatprep.mubr.msk.f32.mxu0 %vm1857_vm0, %v1856_v0 }
 0x417   : > { %v1294_v3 = vpop.permute.xlu1 %1293  ;;  %v1216_v4 = vpop.permute.xlu0 %1215  ;;  %1802 = vmatprep.subr.mxu0 %v1856_v0 }
 0x418   : > { %1798 = vmatpush3.msra.mxu1 %v1216_v4 }
 0x419   : > { %1795 = vmatmul.mubr.msk.f32.vlgmr.msra.gmra.mxu0 %vm334_vm1, %v1697_v1  ;;  %1800 = vmatmul.mubr.msk.f32.vlgmr.msra.gmra.mxu1 %vm334_vm1, %v1699_v2 }
 0x41a   : > { %1803 = vmatpush3.msra.mxu0 %v1294_v3  ;;  %1804 = vmatprep.mubr.msk.f32.mxu0 %vm1857_vm0, %v1856_v0 }
 0x41b   : > { %1812 = vmatprep.subr.mxu0 %v1856_v0  ;;  %1807 = vmatprep.subr.mxu1 %v1856_v0 }
 0x41c   : > { %1809 = vmatprep.mubr.msk.f32.mxu1 %vm1857_vm0, %v1856_v0 }
 0x41d   : > { %1805 = vmatmul.mubr.msk.f32.vlgmr.msra.gmra.mxu0 %vm334_vm1, %v1701_v5 }
 0x41e   : > { %1814 = vmatprep.mubr.msk.f32.mxu0 %vm1857_vm0, %v1856_v0 }
 0x424   : > { %v1375_v19 = vpop.permute.xlu0 %1374 }
 0x463   : > { %v1133_v6 = vpop.f32.mrf.mxu1 }
 0x465   : > { %v1791_v7 = vpop.f32.mrf.mxu1 }
 0x4d5   : > { %v1060_v8 = vpop.f32.mrf.mxu0 }
 0x4d6   : > { %v1134_v10 = vadd.f32 %v1133_v6, %v1060_v8 }
 0x4d7   : > { %v1786_v9 = vpop.f32.mrf.mxu0 }
 0x4d9   : > { %v1210_v11 = vpop.f32.mrf.mxu0  ;;  %v1288_v12 = vpop.f32.mrf.mxu1 }
 0x4da   : > { %v1214_v13 = vadd.f32 %v1210_v11, %v1134_v10 }
 0x4db   : > { %v1796_v14 = vpop.f32.mrf.mxu0  ;;  %v1801_v15 = vpop.f32.mrf.mxu1 }
 0x4dc   : > { %v1292_v16 = vadd.f32 %v1288_v12, %v1214_v13 }
 0x4dd   : > { %v1366_v17 = vpop.f32.mrf.mxu0 }
 0x4de   : > { %v1370_v18 = vadd.f32 %v1366_v17, %v1292_v16 }
 0x4df   : > { %v1806_v20 = vpop.f32.mrf.mxu0 }
 0x4e0   : > { %v1377_v21 = vadd.f32 %v1375_v19, %v1370_v18 }
 0x4e2   : > { %vm1378_vm5 = vcmp.gt.f32.partialorder %v1377_v21, 0.0  ;;  %v1379_v22 = vmul.f32 0.01, %v1377_v21 }
 0x4e4   : > { %v1380_v23 = vsel %vm1378_vm5, %v1377_v21, %v1379_v22 }
 0x4e5   : > { %1532 = vrot.lane.b32.xlu0 %v1380_v23, %s1861_s19  ;;  %1382 = vrot.lane.b32.xlu1 %v1380_v23, %s1859_s17 }
 0x4e6   : > { %1813 = vmatpush3.msra.mxu0 %v1380_v23 }
 0x4e7   : > { %1815 = vmatmul.mubr.msk.f32.vlgmr.msra.gmra.mxu0 %vm334_vm1, %v1381_v24 }
 0x4e9   : > { %1613 = vperm.xlu1 %1841, %v1610_v25  }
 0x557   : > { %v1383_v27 = vpop.permute.xlu1 %1382  ;;  %v1533_v28 = vpop.permute.xlu0 %1532 }
 0x558   : > { %1808 = vmatpush3.msra.mxu1 %v1383_v27 }
 0x559   : > { %1810 = vmatmul.mubr.msk.f32.vlgmr.msra.gmra.mxu1 %vm334_vm1, %v1703_v26  ;;  %1817 = vmatprep.subr.mxu1 %v1856_v0 }
 0x55a   : > { %1818 = vmatpush3.msra.mxu1 %v1533_v28  ;;  %1819 = vmatprep.mubr.msk.f32.mxu1 %vm1857_vm0, %v1856_v0 }
 0x55d   : > { %1820 = vmatmul.mubr.msk.f32.vlgmr.msra.gmra.mxu1 %vm334_vm1, %v1706_v29 }
 0x564   : > { %v1614_v36 = vpop.permute.xlu1 %1613 }
 0x5a7   : > { %v1528_v30 = vpop.f32.mrf.mxu0 }
 0x5a9   : > { %v1816_v31 = vpop.f32.mrf.mxu0 }
 0x619   : > { %v1455_v32 = vpop.f32.mrf.mxu1 }
 0x61a   : > { %v1529_v34 = vadd.f32 %v1528_v30, %v1455_v32 }
 0x61b   : > { %v1811_v33 = vpop.f32.mrf.mxu1 }
 0x61d   : > { %v1605_v35 = vpop.f32.mrf.mxu1 }
 0x61e   : > { %v1609_v37 = vadd.f32 %v1605_v35, %v1529_v34 }
 0x61f   : > { %v1821_v38 = vpop.f32.mrf.mxu1 }
 0x620   : > { %v1616_v39 = vadd.f32 %v1614_v36, %v1609_v37 }
 0x622   : > { %1846 = vtanh.f32 %v1616_v39 }
 0x62f   : > { %v1847_v40 = vpop.eup %1846 }
 0x630   : > { %v1618_v0 = vadd.f32 %v1847_v40, %v2010_v51 }
 0x632   : > { %1619 = vst [vmem:[%s327_s12] sm:$0xff] %v1618_v0 }
 0x633 PF: > { %s19_s30 = sadd.s32 1, %s1854_s30  }
 0x634   : > { %p16_p4 = scmp.ge.s32.totalorder %s19_s30, 4  }
 0x636   :  { %18 = sbr.rel (!%p16_p4) target bundleno = 1 (0x1), region = 98 }

</bundles_post_ra>
